<compile_context>
chip_gen: v7x
topology: tpu7x:2x2x1
jax: 0.10.0
libtpu: 0.0.40
codegen_flags: <defaults>
</compile_context>

<pallas_src>
import functools

import jax
import jax.numpy as jnp
from jax import lax
from jax.experimental import pallas as pl
from jax.experimental.pallas import tpu as pltpu

_NEG_INF = -1e30


def _round_up(x, m):
    return ((x + m - 1) // m) * m


def _vmem_capacity_bytes():
    try:
        info = pltpu.get_tpu_info()
        cap = int(getattr(info, "vmem_capacity_bytes", 0) or 0)
        if cap > 0:
            return cap
    except Exception:
        pass
    return 64 * 1024 * 1024  # conservative fallback (v7x per-TC VMEM)


# ----------------------------------------------------------------------------
# Pallas kernel: row-tiled matmul + bias (used for all 1x1 convolutions)
# bf16 MXU inputs, f32 accumulation, bias added in f32.
# ----------------------------------------------------------------------------
def _matmul_bias_kernel(x_ref, w_ref, b_ref, o_ref):
    acc = jnp.dot(x_ref[...], w_ref[...], preferred_element_type=jnp.float32)
    o_ref[...] = (acc + b_ref[...]).astype(o_ref.dtype)


def matmul_bias(x, w, bias, *, tm=2048, out_dtype=jnp.float32):
    """y = x @ w + bias, row tiled, lane-padded (128) output columns."""
    N, Cin = x.shape
    Cout = w.shape[1]
    Coutp = _round_up(Cout, 128)
    TM = min(tm, _round_up(N, 8))
    Np = _round_up(N, TM)

    x_p = jnp.pad(x.astype(jnp.bfloat16), ((0, Np - N), (0, 0)))
    w_p = jnp.pad(w.astype(jnp.bfloat16), ((0, 0), (0, Coutp - Cout)))
    b_p = jnp.pad(bias.astype(jnp.float32).reshape(1, Cout),
                  ((0, 0), (0, Coutp - Cout)))

    y = pl.pallas_call(
        _matmul_bias_kernel,
        out_shape=jax.ShapeDtypeStruct((Np, Coutp), out_dtype),
        grid=(Np // TM,),
        in_specs=[
            pl.BlockSpec((TM, Cin), lambda i: (i, 0)),
            pl.BlockSpec((Cin, Coutp), lambda i: (0, 0)),
            pl.BlockSpec((1, Coutp), lambda i: (0, 0)),
        ],
        out_specs=pl.BlockSpec((TM, Coutp), lambda i: (i, 0)),
        compiler_params=pltpu.CompilerParams(dimension_semantics=("parallel",)),
    )(x_p, w_p, b_p)
    return y[:N, :Cout]


# ----------------------------------------------------------------------------
# Pallas kernel: flash-style contextual attention core
#   softmax(Wp @ Xp^T * scale, axis=-1) @ Pp   with online softmax over L2 tiles
# ----------------------------------------------------------------------------
def _flash_attn_kernel(wp_ref, xp_ref, pp_ref, o_ref, m_ref, l_ref, acc_ref,
                       *, scale, l2_valid, tk):
    ki = pl.program_id(2)
    nk = pl.num_programs(2)

    @pl.when(ki == 0)
    def _():
        m_ref[...] = jnp.full_like(m_ref, _NEG_INF)
        l_ref[...] = jnp.zeros_like(l_ref)
        acc_ref[...] = jnp.zeros_like(acc_ref)

    q = wp_ref[0]       # [TQ, Dp] bf16 (pre-cast on host side)
    kmat = xp_ref[0]    # [TK, Dp] bf16
    pv = pp_ref[0]      # [TK, Dp] bf16
    # scores: contract over D on the MXU (bf16 in / f32 accumulate)
    s = lax.dot_general(q, kmat, (((1,), (1,)), ((), ())),
                        preferred_element_type=jnp.float32) * scale  # [TQ, TK]

    def update(scores):
        # online softmax; elementwise math kept in f32 (fine on v5e too)
        m_prev = m_ref[...]
        m_new = jnp.maximum(m_prev, jnp.max(scores, axis=-1, keepdims=True))
        alpha = jnp.exp(m_prev - m_new)
        p = jnp.exp(scores - m_new)
        l_ref[...] = alpha * l_ref[...] + jnp.sum(p, axis=-1, keepdims=True)
        acc_ref[...] = alpha * acc_ref[...] + jnp.dot(
            p.astype(jnp.bfloat16), pv, preferred_element_type=jnp.float32)
        m_ref[...] = m_new

    if l2_valid is None:
        update(s)
    else:
        # Padded L2 columns live only in the last ki tile -> mask only there.
        @pl.when(ki < nk - 1)
        def _():
            update(s)

        @pl.when(ki == nk - 1)
        def _():
            col = ki * tk + lax.broadcasted_iota(jnp.int32, s.shape, 1)
            update(jnp.where(col < l2_valid, s, _NEG_INF))

    @pl.when(ki == nk - 1)
    def _():
        o_ref[0] = (acc_ref[...] * pl.reciprocal(l_ref[...], approx=True)
                    ).astype(o_ref.dtype)


def _attn_tile_defaults():
    """TQ, TK defaults by VMEM size: 128 MiB parts (v5e/v6e) vs 64 MiB (v7x)."""
    cap = _vmem_capacity_bytes()
    if cap >= 96 * 1024 * 1024:
        return 1024, 1024
    return 512, 1024


def contextual_attention_core(Wp, Xp, Pp, scale, *, tq=None, tk=None):
    """Per-batch softmax(Wp @ Xp^T * scale, axis=-1) @ Pp.

    Wp: [B, L1, D] (g patches), Xp: [B, L2, D] (phi patches), Pp: [B, L2, D] (theta).
    """
    B, L1, D = Wp.shape
    L2 = Xp.shape[1]

    dtq, dtk = _attn_tile_defaults()
    tq = dtq if tq is None else tq
    tk = dtk if tk is None else tk

    Dp = _round_up(D, 128)
    tq = min(tq, _round_up(L1, 8))
    tk = min(tk, _round_up(L2, 128))

    # Megacore: v7x has 2 TensorCores; make sure B * nq >= 2 when possible.
    if B == 1 and _round_up(L1, tq) // tq < 2 and L1 > 8:
        tq = max(8, _round_up((L1 + 1) // 2, 8))

    L1p = _round_up(L1, tq)
    L2p = _round_up(L2, tk)

    # Pad fused with the bf16 cast: staging copies in HBM are half-size.
    Wp_p = jnp.pad(Wp.astype(jnp.bfloat16), ((0, 0), (0, L1p - L1), (0, Dp - D)))
    Xp_p = jnp.pad(Xp.astype(jnp.bfloat16), ((0, 0), (0, L2p - L2), (0, Dp - D)))
    Pp_p = jnp.pad(Pp.astype(jnp.bfloat16), ((0, 0), (0, L2p - L2), (0, Dp - D)))

    nq = L1p // tq
    nk = L2p // tk
    l2_valid = L2 if L2p != L2 else None

    kernel = functools.partial(_flash_attn_kernel, scale=float(scale),
                               l2_valid=l2_valid, tk=tk)

    # When nk == 1 the K/V block index never changes across qi -> Pallas skips
    # the redundant re-DMA, so don't count the re-stream in that case.
    restream = nq if nk > 1 else 1
    cost = pl.CostEstimate(
        flops=4 * B * L1p * L2p * Dp,                      # two matmuls
        transcendentals=B * L1p * L2p,                     # exp
        bytes_accessed=(2 * Wp_p.size
                        + 2 * restream * (Xp_p.size + Pp_p.size)
                        + 4 * B * L1p * Dp))

    # VMEM budget: bf16 input tiles (double-buffered) + f32 output tile +
    # f32 scratch + f32 score temporaries.
    est = (2 * 2 * tq * Dp                  # Wp tile, bf16, 2 buffers
           + 2 * 2 * 2 * tk * Dp            # Xp + Pp tiles, bf16, 2 buffers
           + 2 * 4 * tq * Dp                # output tile, f32, 2 buffers
           + 4 * (tq * Dp + 2 * tq)         # acc / m / l scratch (f32)
           + 4 * 3 * tq * tk)               # score / p temporaries (f32)
    cap = _vmem_capacity_bytes() - 8 * 1024 * 1024  # headroom for Mosaic scratch
    vmem_limit = int(max(16 * 1024 * 1024,
                         min(cap, max(32 * 1024 * 1024, 2 * est))))

    out = pl.pallas_call(
        kernel,
        out_shape=jax.ShapeDtypeStruct((B, L1p, Dp), jnp.float32),
        grid=(B, nq, nk),
        in_specs=[
            pl.BlockSpec((1, tq, Dp), lambda b, qi, ki: (b, qi, 0)),
            pl.BlockSpec((1, tk, Dp), lambda b, qi, ki: (b, ki, 0)),
            pl.BlockSpec((1, tk, Dp), lambda b, qi, ki: (b, ki, 0)),
        ],
        out_specs=pl.BlockSpec((1, tq, Dp), lambda b, qi, ki: (b, qi, 0)),
        scratch_shapes=[
            pltpu.VMEM((tq, 1), jnp.float32),    # running max
            pltpu.VMEM((tq, 1), jnp.float32),    # running sum
            pltpu.VMEM((tq, Dp), jnp.float32),   # accumulator
        ],
        compiler_params=pltpu.CompilerParams(
            dimension_semantics=("parallel", "parallel", "arbitrary"),
            vmem_limit_bytes=vmem_limit),
        cost_estimate=cost,
    )(Wp_p, Xp_p, Pp_p)
    return out[:, :L1, :D]


# ----------------------------------------------------------------------------
# JAX glue: same padding, unfold, fold — all in NHWC, exact torch semantics
# ----------------------------------------------------------------------------
def _same_padding_pads(H, W, k, s):
    out_r = -(-H // s)
    out_c = -(-W // s)
    pad_r = max(0, (out_r - 1) * s + k - H)
    pad_c = max(0, (out_c - 1) * s + k - W)
    top = pad_r // 2
    left = pad_c // 2
    return left, pad_c - left, top, pad_r - top


def extract_patches_nhwc(x, k, s):
    """torch.nn.Unfold after 'same' zero padding, NHWC layout.

    x: [B, H, W, C] -> patches [B, L, k*k*C] with (ki, kj, c) feature ordering.
    """
    # TODO(synk): at real colanet sizes, gather the k x k window per L2 tile
    # inside the attention kernel (pl.ANY + manual DMA) instead of
    # materializing the k^2-inflated patch arrays in HBM.
    B, H, W, C = x.shape
    left, right, top, bottom = _same_padding_pads(H, W, k, s)
    xp = jnp.pad(x, ((0, 0), (top, bottom), (left, right), (0, 0)))
    Hp, Wpd = H + top + bottom, W + left + right
    oh = (Hp - k) // s + 1
    ow = (Wpd - k) // s + 1
    parts = []
    for i in range(k):
        for j in range(k):
            parts.append(xp[:, i:i + (oh - 1) * s + 1:s,
                            j:j + (ow - 1) * s + 1:s, :])   # [B, oh, ow, C]
    patches = jnp.stack(parts, axis=3)                       # [B, oh, ow, k*k, C]
    return patches.reshape(B, oh * ow, k * k * C), (oh, ow)


def fold_nhwc(cols, out_hw, k, pad, s):
    """torch.nn.functional.fold (overlap-add), NHWC; cols: [L, k*k*C] -> [H, W, C]."""
    H, W = out_hw
    L, KKC = cols.shape
    C = KKC // (k * k)
    oh = (H + 2 * pad - k) // s + 1
    ow = (W + 2 * pad - k) // s + 1
    cols = cols.reshape(oh, ow, k, k, C)
    out = jnp.zeros((H + 2 * pad, W + 2 * pad, C), cols.dtype)
    for i in range(k):
        for j in range(k):
            out = out.at[i:i + (oh - 1) * s + 1:s,
                         j:j + (ow - 1) * s + 1:s, :].add(cols[:, :, i, j, :])
    return out[pad:pad + H, pad:pad + W, :]


# ----------------------------------------------------------------------------
# Full forward pass
# ----------------------------------------------------------------------------
def contextual_attention_enhance(b, params, *, ksize, stride_1, stride_2,
                                 softmax_scale):
    B, Cin, H, W = b.shape
    k = ksize
    Ci = params["g_w"].shape[1]
    D = Ci * k * k

    x_nhwc = jnp.transpose(b, (0, 2, 3, 1))                    # single NCHW->NHWC

    # Fused g/theta/phi 1x1 projections as ONE Pallas matmul over pixels (bf16 out:
    # the attention core consumes bf16 anyway, and the patch arrays built from the
    # projection are k^2-inflated, so bf16 halves their HBM footprint).
    w_fused = jnp.concatenate(
        [params["g_w"], params["theta_w"], params["phi_w"]], axis=1)
    b_fused = jnp.concatenate(
        [params["g_b"], params["theta_b"], params["phi_b"]], axis=0)
    proj = matmul_bias(x_nhwc.reshape(B * H * W, Cin), w_fused, b_fused,
                       out_dtype=jnp.bfloat16)
    proj = proj.reshape(B, H, W, 3 * Ci)
    g_x = proj[..., 0:Ci]           # g
    theta_x = proj[..., Ci:2 * Ci]  # theta
    phi_x = proj[..., 2 * Ci:]      # phi

    # Patch extraction ('same' padding); (ki, kj, c) ordering used consistently.
    Wp, _ = extract_patches_nhwc(g_x, k, stride_1)       # [B, L1, D]  (wi)
    Pp, _ = extract_patches_nhwc(theta_x, k, stride_2)   # [B, L2, D]  (pi)
    Xp, _ = extract_patches_nhwc(phi_x, k, stride_2)     # [B, L2, D]  (xi)
    L1 = Wp.shape[1]

    # Hot path: scores -> scaled softmax -> weighted sum of theta patches.
    Y = contextual_attention_core(Wp, Xp, Pp, float(softmax_scale))  # [B, L1, D] f32

    # Fold back with symmetric padding = paddings[0] of stride-1 same padding.
    pad_fold = (k - 1) // 2
    mask = fold_nhwc(jnp.ones((L1, D), jnp.float32), (H, W), k, pad_fold, stride_1)
    z = jax.vmap(lambda cols: fold_nhwc(cols, (H, W), k, pad_fold, stride_1))(Y)
    z = z / mask[None]                                    # [B, H, W, Ci]

    # Output projection W (f32 out for the residual) and residual add.
    y = matmul_bias(z.reshape(B * H * W, Ci), params["W_w"], params["W_b"])
    y = y.reshape(B, H, W, Cin)
    out_nhwc = x_nhwc + y
    return jnp.transpose(out_nhwc, (0, 3, 1, 2))
    # TODO(synk): add_SE / conv33 branch omitted (self.SE is never defined in the reference __init__).


# ----------------------------------------------------------------------------
# Pure-JAX reference (f32, exact softmax) for correctness checking
# ----------------------------------------------------------------------------
def _reference_forward(b, params, *, ksize, stride_1, stride_2, softmax_scale):
    B, Cin, H, W = b.shape
    k = ksize
    Ci = params["g_w"].shape[1]
    x = jnp.transpose(b, (0, 2, 3, 1))
    g_x = x @ params["g_w"] + params["g_b"]
    theta_x = x @ params["theta_w"] + params["theta_b"]
    phi_x = x @ params["phi_w"] + params["phi_b"]
    Wp, _ = extract_patches_nhwc(g_x, k, stride_1)
    Pp, _ = extract_patches_nhwc(theta_x, k, stride_2)
    Xp, _ = extract_patches_nhwc(phi_x, k, stride_2)
    s = jnp.einsum("bld,bmd->blm", Wp, Xp) * softmax_scale
    a = jax.nn.softmax(s, axis=-1)
    Y = jnp.einsum("blm,bmd->bld", a, Pp)
    pad_fold = (k - 1) // 2
    mask = fold_nhwc(jnp.ones((Wp.shape[1], Ci * k * k), jnp.float32),
                     (H, W), k, pad_fold, stride_1)
    z = jax.vmap(lambda c: fold_nhwc(c, (H, W), k, pad_fold, stride_1))(Y)
    z = z / mask[None]
    y = z @ params["W_w"] + params["W_b"]
    return jnp.transpose(x + y, (0, 3, 1, 2))


# ----------------------------------------------------------------------------
# Driver
# ----------------------------------------------------------------------------
def make_params(key, in_channels, inter_channels):
    ks = jax.random.split(key, 8)

    def w(k_, cin, cout):
        return (0.05 * jax.random.normal(k_, (cin, cout))).astype(jnp.float32)

    def bvec(k_, c):
        return (0.01 * jax.random.normal(k_, (c,))).astype(jnp.float32)

    return {
        "g_w": w(ks[0], in_channels, inter_channels),
        "g_b": bvec(ks[1], inter_channels),
        "theta_w": w(ks[2], in_channels, inter_channels),
        "theta_b": bvec(ks[3], inter_channels),
        "phi_w": w(ks[4], in_channels, inter_channels),
        "phi_b": bvec(ks[5], inter_channels),
        "W_w": w(ks[6], inter_channels, in_channels),
        "W_b": bvec(ks[7], in_channels),
    }


if __name__ == "__main__":
    # Small config consistent with the module's forward:
    # B=2, in_channels=8, inter_channels=4, H=W=8, ksize=3, stride_1=2, stride_2=1
    B, Cin, H, W = 2, 8, 8, 8
    inter_channels = 4
    ksize, stride_1, stride_2, softmax_scale = 3, 2, 1, 10

    key = jax.random.PRNGKey(0)
    kx, kp = jax.random.split(key)
    x = jax.random.normal(kx, (B, Cin, H, W), dtype=jnp.float32)
    params = make_params(kp, Cin, inter_channels)

    fwd = jax.jit(functools.partial(
        contextual_attention_enhance,
        ksize=ksize, stride_1=stride_1, stride_2=stride_2,
        softmax_scale=softmax_scale))
    out = fwd(x, params)
    jax.block_until_ready(out)
    assert out.shape == (B, Cin, H, W)

    # Loose check vs pure-JAX f32 reference (kernel uses bf16 MXU inputs).
    ref = _reference_forward(x, params, ksize=ksize, stride_1=stride_1,
                             stride_2=stride_2, softmax_scale=softmax_scale)
    assert bool(jnp.allclose(out, ref, rtol=3e-2, atol=3e-2)), \
        float(jnp.max(jnp.abs(out - ref)))

    # Online-softmax consistency: multi-tile (tq=8, tk=128) vs default single tile.
    kq, kk, kv = jax.random.split(jax.random.PRNGKey(1), 3)
    L1c, L2c, Dc = 16, 300, 36
    qc = jax.random.normal(kq, (B, L1c, Dc), jnp.float32)
    kc = jax.random.normal(kk, (B, L2c, Dc), jnp.float32)
    vc = jax.random.normal(kv, (B, L2c, Dc), jnp.float32)
    o_big = contextual_attention_core(qc, kc, vc, 1.0)
    o_small = contextual_attention_core(qc, kc, vc, 1.0, tq=8, tk=128)
    assert bool(jnp.allclose(o_big, o_small, rtol=2e-2, atol=2e-2))

    print("KERNEL_OK")
</pallas_src>

<mosaic_0001>
module attributes {stable_mosaic.version = 11 : i64} {
  func.func @_matmul_bias_kernel(%arg0: i32, %arg1: memref<128x8xbf16, #tpu.memory_space<vmem>>, %arg2: memref<8x128xbf16, #tpu.memory_space<vmem>>, %arg3: memref<1x128xf32, #tpu.memory_space<vmem>>, %arg4: memref<128x128xbf16, #tpu.memory_space<vmem>>) attributes {dimension_semantics = [#tpu.dimension_semantics<parallel>], iteration_bounds = array<i64: 1>, scalar_prefetch = 0 : i64, scratch_operands = 0 : i64, tpu.core_type = #tpu.core_type<tc>, window_params = [{transform_indices = @transform_0, window_bounds = array<i64: 128, 8>}, {pipeline_mode = #tpu.pipeline_mode<synchronous>, transform_indices = @transform_1, window_bounds = array<i64: 8, 128>}, {pipeline_mode = #tpu.pipeline_mode<synchronous>, transform_indices = @transform_2, window_bounds = array<i64: 1, 128>}, {transform_indices = @transform_3, window_bounds = array<i64: 128, 128>}]} {
    %c0 = arith.constant 0 : index
    %c0_0 = arith.constant 0 : index
    %0 = vector.load %arg1[%c0, %c0_0] : memref<128x8xbf16, #tpu.memory_space<vmem>>, vector<128x8xbf16>
    %c0_1 = arith.constant 0 : index
    %c0_2 = arith.constant 0 : index
    %1 = vector.load %arg2[%c0_1, %c0_2] : memref<8x128xbf16, #tpu.memory_space<vmem>>, vector<8x128xbf16>
    %cst = arith.constant dense<0.000000e+00> : vector<128x128xf32>
    %2 = tpu.matmul %0, %1, %cst {dimension_numbers = #tpu.dot_dimension_numbers<[1], [0], [0], [1], [0, 0, 1, 1], [], []>} : vector<128x8xbf16>, vector<8x128xbf16>, vector<128x128xf32> -> vector<128x128xf32>
    %c0_3 = arith.constant 0 : index
    %c0_4 = arith.constant 0 : index
    %3 = vector.load %arg3[%c0_3, %c0_4] : memref<1x128xf32, #tpu.memory_space<vmem>>, vector<1x128xf32>
    %4 = vector.broadcast %3 : vector<1x128xf32> to vector<128x128xf32>
    %5 = arith.addf %2, %4 : vector<128x128xf32>
    %6 = arith.truncf %5 : vector<128x128xf32> to vector<128x128xbf16>
    %c0_5 = arith.constant 0 : index
    %c0_6 = arith.constant 0 : index
    %7 = vector.load %arg4[%c0_5, %c0_6] : memref<128x128xbf16, #tpu.memory_space<vmem>>, vector<128x128xbf16>
    tpu.vector_store %arg4[%c0_5, %c0_6], %6 {strides = array<i32>} : memref<128x128xbf16, #tpu.memory_space<vmem>>, vector<128x128xbf16>,
    return
  }
  func.func @transform_0(%arg0: i32) -> (i32, i32) {
    %c0_i32 = arith.constant 0 : i32
    %c0_i32_0 = arith.constant 0 : i32
    return %arg0, %c0_i32 : i32, i32
  }
  func.func @transform_1(%arg0: i32) -> (i32, i32) {
    %c0_i32 = arith.constant 0 : i32
    %c0_i32_0 = arith.constant 0 : i32
    %c0_i32_1 = arith.constant 0 : i32
    return %c0_i32, %c0_i32_0 : i32, i32
  }
  func.func @transform_2(%arg0: i32) -> (i32, i32) {
    %c0_i32 = arith.constant 0 : i32
    %c0_i32_0 = arith.constant 0 : i32
    %c0_i32_1 = arith.constant 0 : i32
    return %c0_i32, %c0_i32_0 : i32, i32
  }
  func.func @transform_3(%arg0: i32) -> (i32, i32) {
    %c0_i32 = arith.constant 0 : i32
    %c0_i32_0 = arith.constant 0 : i32
    return %arg0, %c0_i32 : i32, i32
  }
}

module attributes {stable_mosaic.version = 11 : i64} {
  func.func @_flash_attn_kernel(%arg0: i32, %arg1: i32, %arg2: i32, %arg3: memref<1x16x128xbf16, #tpu.memory_space<vmem>>, %arg4: memref<1x128x128xbf16, #tpu.memory_space<vmem>>, %arg5: memref<1x128x128xbf16, #tpu.memory_space<vmem>>, %arg6: memref<1x16x128xf32, #tpu.memory_space<vmem>>, %arg7: memref<16x1xf32, #tpu.memory_space<vmem>>, %arg8: memref<16x1xf32, #tpu.memory_space<vmem>>, %arg9: memref<16x128xf32, #tpu.memory_space<vmem>>) attributes {dimension_semantics = [#tpu.dimension_semantics<parallel>, #tpu.dimension_semantics<parallel>, #tpu.dimension_semantics<arbitrary>], iteration_bounds = array<i64: 2, 1, 1>, scalar_prefetch = 0 : i64, scratch_operands = 3 : i64, tpu.core_type = #tpu.core_type<tc>, window_params = [{transform_indices = @transform_0, window_bounds = array<i64: 1, 16, 128>}, {transform_indices = @transform_1, window_bounds = array<i64: 1, 128, 128>}, {transform_indices = @transform_2, window_bounds = array<i64: 1, 128, 128>}, {transform_indices = @transform_3, window_bounds = array<i64: 1, 16, 128>}]} {
    %c0_i32 = arith.constant 0 : i32
    %0 = arith.cmpi eq, %arg2, %c0_i32 : i32
    %1 = arith.extui %0 : i1 to i32
    %c0_i32_0 = arith.constant 0 : i32
    %2 = arith.cmpi ne, %1, %c0_i32_0 : i32
    scf.if %2 {
      %cst_16 = arith.constant -1.000000e+30 : f32
      %21 = vector.broadcast %cst_16 : f32 to vector<16x1xf32>
      %c0_17 = arith.constant 0 : index
      %c0_18 = arith.constant 0 : index
      %22 = vector.load %arg7[%c0_17, %c0_18] : memref<16x1xf32, #tpu.memory_space<vmem>>, vector<16x1xf32>
      tpu.vector_store %arg7[%c0_17, %c0_18], %21 {strides = array<i32>} : memref<16x1xf32, #tpu.memory_space<vmem>>, vector<16x1xf32>,
      %cst_19 = arith.constant 0.000000e+00 : f32
      %23 = vector.broadcast %cst_19 : f32 to vector<16x1xf32>
      %c0_20 = arith.constant 0 : index
      %c0_21 = arith.constant 0 : index
      %24 = vector.load %arg8[%c0_20, %c0_21] : memref<16x1xf32, #tpu.memory_space<vmem>>, vector<16x1xf32>
      tpu.vector_store %arg8[%c0_20, %c0_21], %23 {strides = array<i32>} : memref<16x1xf32, #tpu.memory_space<vmem>>, vector<16x1xf32>,
      %cst_22 = arith.constant 0.000000e+00 : f32
      %25 = vector.broadcast %cst_22 : f32 to vector<16x128xf32>
      %c0_23 = arith.constant 0 : index
      %c0_24 = arith.constant 0 : index
      %26 = vector.load %arg9[%c0_23, %c0_24] : memref<16x128xf32, #tpu.memory_space<vmem>>, vector<16x128xf32>
      tpu.vector_store %arg9[%c0_23, %c0_24], %25 {strides = array<i32>} : memref<16x128xf32, #tpu.memory_space<vmem>>, vector<16x128xf32>,
    } else {
    }
    %c0 = arith.constant 0 : index
    %c0_1 = arith.constant 0 : index
    %c0_2 = arith.constant 0 : index
    %3 = vector.load %arg3[%c0, %c0_1, %c0_2] : memref<1x16x128xbf16, #tpu.memory_space<vmem>>, vector<1x16x128xbf16>
    %4 = vector.shape_cast %3 : vector<1x16x128xbf16> to vector<16x128xbf16>
    %c0_3 = arith.constant 0 : index
    %c0_4 = arith.constant 0 : index
    %c0_5 = arith.constant 0 : index
    %5 = vector.load %arg4[%c0_3, %c0_4, %c0_5] : memref<1x128x128xbf16, #tpu.memory_space<vmem>>, vector<1x128x128xbf16>
    %6 = vector.shape_cast %5 : vector<1x128x128xbf16> to vector<128x128xbf16>
    %c0_6 = arith.constant 0 : index
    %c0_7 = arith.constant 0 : index
    %c0_8 = arith.constant 0 : index
    %7 = vector.load %arg5[%c0_6, %c0_7, %c0_8] : memref<1x128x128xbf16, #tpu.memory_space<vmem>>, vector<1x128x128xbf16>
    %8 = vector.shape_cast %7 : vector<1x128x128xbf16> to vector<128x128xbf16>
    %cst = arith.constant dense<0.000000e+00> : vector<16x128xf32>
    %9 = tpu.matmul %4, %6, %cst {dimension_numbers = #tpu.dot_dimension_numbers<[1], [1], [0], [0], [0, 0, 1, 0], [], []>} : vector<16x128xbf16>, vector<128x128xbf16>, vector<16x128xf32> -> vector<16x128xf32>
    %cst_9 = arith.constant 1.000000e+01 : f32
    %10 = vector.broadcast %cst_9 : f32 to vector<16x128xf32>
    %11 = arith.mulf %9, %10 : vector<16x128xf32>
    %c0_i32_10 = arith.constant 0 : i32
    %12 = arith.cmpi slt, %arg2, %c0_i32_10 : i32
    %13 = arith.extui %12 : i1 to i32
    %c0_i32_11 = arith.constant 0 : i32
    %14 = arith.cmpi ne, %13, %c0_i32_11 : i32
    scf.if %14 {
      %c0_16 = arith.constant 0 : index
      %c0_17 = arith.constant 0 : index
      %21 = vector.load %arg7[%c0_16, %c0_17] : memref<16x1xf32, #tpu.memory_space<vmem>>, vector<16x1xf32>
      %cst_18 = arith.constant dense<0xFF800000> : vector<16xf32>
      %22 = vector.multi_reduction <maximumf>, %11, %cst_18 [1] : vector<16x128xf32> to vector<16xf32>
      %23 = vector.shape_cast %22 : vector<16xf32> to vector<16x1xf32>
      %24 = arith.maximumf %21, %23 : vector<16x1xf32>
      %25 = arith.subf %21, %24 : vector<16x1xf32>
      %26 = math.exp %25 : vector<16x1xf32>
      %27 = vector.broadcast %24 : vector<16x1xf32> to vector<16x128xf32>
      %28 = arith.subf %11, %27 : vector<16x128xf32>
      %29 = math.exp %28 : vector<16x128xf32>
      %c0_19 = arith.constant 0 : index
      %c0_20 = arith.constant 0 : index
      %30 = vector.load %arg8[%c0_19, %c0_20] : memref<16x1xf32, #tpu.memory_space<vmem>>, vector<16x1xf32>
      %31 = arith.mulf %26, %30 : vector<16x1xf32>
      %cst_21 = arith.constant dense<0.000000e+00> : vector<16xf32>
      %32 = vector.multi_reduction <add>, %29, %cst_21 [1] : vector<16x128xf32> to vector<16xf32>
      %33 = vector.shape_cast %32 : vector<16xf32> to vector<16x1xf32>
      %34 = arith.addf %31, %33 : vector<16x1xf32>
      %c0_22 = arith.constant 0 : index
      %c0_23 = arith.constant 0 : index
      %35 = vector.load %arg8[%c0_22, %c0_23] : memref<16x1xf32, #tpu.memory_space<vmem>>, vector<16x1xf32>
      tpu.vector_store %arg8[%c0_22, %c0_23], %34 {strides = array<i32>} : memref<16x1xf32, #tpu.memory_space<vmem>>, vector<16x1xf32>,
      %c0_24 = arith.constant 0 : index
      %c0_25 = arith.constant 0 : index
      %36 = vector.load %arg9[%c0_24, %c0_25] : memref<16x128xf32, #tpu.memory_space<vmem>>, vector<16x128xf32>
      %37 = vector.broadcast %26 : vector<16x1xf32> to vector<16x128xf32>
      %38 = arith.mulf %37, %36 : vector<16x128xf32>
      %39 = arith.truncf %29 : vector<16x128xf32> to vector<16x128xbf16>
      %cst_26 = arith.constant dense<0.000000e+00> : vector<16x128xf32>
      %40 = tpu.matmul %39, %8, %cst_26 {dimension_numbers = #tpu.dot_dimension_numbers<[1], [0], [0], [1], [0, 0, 1, 1], [], []>} : vector<16x128xbf16>, vector<128x128xbf16>, vector<16x128xf32> -> vector<16x128xf32>
      %41 = arith.addf %38, %40 : vector<16x128xf32>
      %c0_27 = arith.constant 0 : index
      %c0_28 = arith.constant 0 : index
      %42 = vector.load %arg9[%c0_27, %c0_28] : memref<16x128xf32, #tpu.memory_space<vmem>>, vector<16x128xf32>
      tpu.vector_store %arg9[%c0_27, %c0_28], %41 {strides = array<i32>} : memref<16x128xf32, #tpu.memory_space<vmem>>, vector<16x128xf32>,
      %c0_29 = arith.constant 0 : index
      %c0_30 = arith.constant 0 : index
      %43 = vector.load %arg7[%c0_29, %c0_30] : memref<16x1xf32, #tpu.memory_space<vmem>>, vector<16x1xf32>
      tpu.vector_store %arg7[%c0_29, %c0_30], %24 {strides = array<i32>} : memref<16x1xf32, #tpu.memory_space<vmem>>, vector<16x1xf32>,
    } else {
    }
    %c0_i32_12 = arith.constant 0 : i32
    %15 = arith.cmpi eq, %arg2, %c0_i32_12 : i32
    %16 = arith.extui %15 : i1 to i32
    %c0_i32_13 = arith.constant 0 : i32
    %17 = arith.cmpi ne, %16, %c0_i32_13 : i32
    scf.if %17 {
      %c128_i32 = arith.constant 128 : i32
      %21 = arith.muli %arg2, %c128_i32 : i32
      %22 = tpu.iota {dimensions = array<i32: 1>} : vector<16x128xi32>
      %23 = vector.broadcast %21 : i32 to vector<16x128xi32>
      %24 = arith.addi %23, %22 : vector<16x128xi32>
      %c64_i32 = arith.constant 64 : i32
      %25 = vector.broadcast %c64_i32 : i32 to vector<16x128xi32>
      %26 = arith.cmpi slt, %24, %25 : vector<16x128xi32>
      %cst_16 = arith.constant -1.000000e+30 : f32
      %27 = vector.broadcast %cst_16 : f32 to vector<16x128xf32>
      %28 = arith.select %26, %11, %27 : vector<16x128xi1>, vector<16x128xf32>
      %c0_17 = arith.constant 0 : index
      %c0_18 = arith.constant 0 : index
      %29 = vector.load %arg7[%c0_17, %c0_18] : memref<16x1xf32, #tpu.memory_space<vmem>>, vector<16x1xf32>
      %cst_19 = arith.constant dense<0xFF800000> : vector<16xf32>
      %30 = vector.multi_reduction <maximumf>, %28, %cst_19 [1] : vector<16x128xf32> to vector<16xf32>
      %31 = vector.shape_cast %30 : vector<16xf32> to vector<16x1xf32>
      %32 = arith.maximumf %29, %31 : vector<16x1xf32>
      %33 = arith.subf %29, %32 : vector<16x1xf32>
      %34 = math.exp %33 : vector<16x1xf32>
      %35 = vector.broadcast %32 : vector<16x1xf32> to vector<16x128xf32>
      %36 = arith.subf %28, %35 : vector<16x128xf32>
      %37 = math.exp %36 : vector<16x128xf32>
      %c0_20 = arith.constant 0 : index
      %c0_21 = arith.constant 0 : index
      %38 = vector.load %arg8[%c0_20, %c0_21] : memref<16x1xf32, #tpu.memory_space<vmem>>, vector<16x1xf32>
      %39 = arith.mulf %34, %38 : vector<16x1xf32>
      %cst_22 = arith.constant dense<0.000000e+00> : vector<16xf32>
      %40 = vector.multi_reduction <add>, %37, %cst_22 [1] : vector<16x128xf32> to vector<16xf32>
      %41 = vector.shape_cast %40 : vector<16xf32> to vector<16x1xf32>
      %42 = arith.addf %39, %41 : vector<16x1xf32>
      %c0_23 = arith.constant 0 : index
      %c0_24 = arith.constant 0 : index
      %43 = vector.load %arg8[%c0_23, %c0_24] : memref<16x1xf32, #tpu.memory_space<vmem>>, vector<16x1xf32>
      tpu.vector_store %arg8[%c0_23, %c0_24], %42 {strides = array<i32>} : memref<16x1xf32, #tpu.memory_space<vmem>>, vector<16x1xf32>,
      %c0_25 = arith.constant 0 : index
      %c0_26 = arith.constant 0 : index
      %44 = vector.load %arg9[%c0_25, %c0_26] : memref<16x128xf32, #tpu.memory_space<vmem>>, vector<16x128xf32>
      %45 = vector.broadcast %34 : vector<16x1xf32> to vector<16x128xf32>
      %46 = arith.mulf %45, %44 : vector<16x128xf32>
      %47 = arith.truncf %37 : vector<16x128xf32> to vector<16x128xbf16>
      %cst_27 = arith.constant dense<0.000000e+00> : vector<16x128xf32>
      %48 = tpu.matmul %47, %8, %cst_27 {dimension_numbers = #tpu.dot_dimension_numbers<[1], [0], [0], [1], [0, 0, 1, 1], [], []>} : vector<16x128xbf16>, vector<128x128xbf16>, vector<16x128xf32> -> vector<16x128xf32>
      %49 = arith.addf %46, %48 : vector<16x128xf32>
      %c0_28 = arith.constant 0 : index
      %c0_29 = arith.constant 0 : index
      %50 = vector.load %arg9[%c0_28, %c0_29] : memref<16x128xf32, #tpu.memory_space<vmem>>, vector<16x128xf32>
      tpu.vector_store %arg9[%c0_28, %c0_29], %49 {strides = array<i32>} : memref<16x128xf32, #tpu.memory_space<vmem>>, vector<16x128xf32>,
      %c0_30 = arith.constant 0 : index
      %c0_31 = arith.constant 0 : index
      %51 = vector.load %arg7[%c0_30, %c0_31] : memref<16x1xf32, #tpu.memory_space<vmem>>, vector<16x1xf32>
      tpu.vector_store %arg7[%c0_30, %c0_31], %32 {strides = array<i32>} : memref<16x1xf32, #tpu.memory_space<vmem>>, vector<16x1xf32>,
    } else {
    }
    %c0_i32_14 = arith.constant 0 : i32
    %18 = arith.cmpi eq, %arg2, %c0_i32_14 : i32
    %19 = arith.extui %18 : i1 to i32
    %c0_i32_15 = arith.constant 0 : i32
    %20 = arith.cmpi ne, %19, %c0_i32_15 : i32
    scf.if %20 {
      %c0_16 = arith.constant 0 : index
      %c0_17 = arith.constant 0 : index
      %21 = vector.load %arg9[%c0_16, %c0_17] : memref<16x128xf32, #tpu.memory_space<vmem>>, vector<16x128xf32>
      %c0_18 = arith.constant 0 : index
      %c0_19 = arith.constant 0 : index
      %22 = vector.load %arg8[%c0_18, %c0_19] : memref<16x1xf32, #tpu.memory_space<vmem>>, vector<16x1xf32>
      %23 = tpu.reciprocal %22 {approx = true} : vector<16x1xf32> -> vector<16x1xf32>
      %24 = vector.broadcast %23 : vector<16x1xf32> to vector<16x128xf32>
      %25 = arith.mulf %21, %24 : vector<16x128xf32>
      %c0_20 = arith.constant 0 : index
      %c0_21 = arith.constant 0 : index
      %c0_22 = arith.constant 0 : index
      %26 = vector.load %arg6[%c0_20, %c0_21, %c0_22] : memref<1x16x128xf32, #tpu.memory_space<vmem>>, vector<1x16x128xf32>
      %27 = vector.shape_cast %26 : vector<1x16x128xf32> to vector<16x128xf32>
      %28 = vector.shape_cast %25 : vector<16x128xf32> to vector<1x16x128xf32>
      tpu.vector_store %arg6[%c0_20, %c0_21, %c0_22], %28 {strides = array<i32>} : memref<1x16x128xf32, #tpu.memory_space<vmem>>, vector<1x16x128xf32>,
    } else {
    }
    return
  }
  func.func @transform_0(%arg0: i32, %arg1: i32, %arg2: i32) -> (i32, i32, i32) {
    %c0_i32 = arith.constant 0 : i32
    %c0_i32_0 = arith.constant 0 : i32
    return %arg0, %arg1, %c0_i32 : i32, i32, i32
  }
  func.func @transform_1(%arg0: i32, %arg1: i32, %arg2: i32) -> (i32, i32, i32) {
    %c0_i32 = arith.constant 0 : i32
    %c0_i32_0 = arith.constant 0 : i32
    return %arg0, %arg2, %c0_i32 : i32, i32, i32
  }
  func.func @transform_2(%arg0: i32, %arg1: i32, %arg2: i32) -> (i32, i32, i32) {
    %c0_i32 = arith.constant 0 : i32
    %c0_i32_0 = arith.constant 0 : i32
    return %arg0, %arg2, %c0_i32 : i32, i32, i32
  }
  func.func @transform_3(%arg0: i32, %arg1: i32, %arg2: i32) -> (i32, i32, i32) {
    %c0_i32 = arith.constant 0 : i32
    %c0_i32_0 = arith.constant 0 : i32
    return %arg0, %arg1, %c0_i32 : i32, i32, i32
  }
}

module attributes {stable_mosaic.version = 11 : i64} {
  func.func @_matmul_bias_kernel(%arg0: i32, %arg1: memref<128x4xbf16, #tpu.memory_space<vmem>>, %arg2: memref<4x128xbf16, #tpu.memory_space<vmem>>, %arg3: memref<1x128xf32, #tpu.memory_space<vmem>>, %arg4: memref<128x128xf32, #tpu.memory_space<vmem>>) attributes {dimension_semantics = [#tpu.dimension_semantics<parallel>], iteration_bounds = array<i64: 1>, scalar_prefetch = 0 : i64, scratch_operands = 0 : i64, tpu.core_type = #tpu.core_type<tc>, window_params = [{transform_indices = @transform_0, window_bounds = array<i64: 128, 4>}, {pipeline_mode = #tpu.pipeline_mode<synchronous>, transform_indices = @transform_1, window_bounds = array<i64: 4, 128>}, {pipeline_mode = #tpu.pipeline_mode<synchronous>, transform_indices = @transform_2, window_bounds = array<i64: 1, 128>}, {transform_indices = @transform_3, window_bounds = array<i64: 128, 128>}]} {
    %c0 = arith.constant 0 : index
    %c0_0 = arith.constant 0 : index
    %0 = vector.load %arg1[%c0, %c0_0] : memref<128x4xbf16, #tpu.memory_space<vmem>>, vector<128x4xbf16>
    %c0_1 = arith.constant 0 : index
    %c0_2 = arith.constant 0 : index
    %1 = vector.load %arg2[%c0_1, %c0_2] : memref<4x128xbf16, #tpu.memory_space<vmem>>, vector<4x128xbf16>
    %cst = arith.constant dense<0.000000e+00> : vector<128x128xf32>
    %2 = tpu.matmul %0, %1, %cst {dimension_numbers = #tpu.dot_dimension_numbers<[1], [0], [0], [1], [0, 0, 1, 1], [], []>} : vector<128x4xbf16>, vector<4x128xbf16>, vector<128x128xf32> -> vector<128x128xf32>
    %c0_3 = arith.constant 0 : index
    %c0_4 = arith.constant 0 : index
    %3 = vector.load %arg3[%c0_3, %c0_4] : memref<1x128xf32, #tpu.memory_space<vmem>>, vector<1x128xf32>
    %4 = vector.broadcast %3 : vector<1x128xf32> to vector<128x128xf32>
    %5 = arith.addf %2, %4 : vector<128x128xf32>
    %c0_5 = arith.constant 0 : index
    %c0_6 = arith.constant 0 : index
    %6 = vector.load %arg4[%c0_5, %c0_6] : memref<128x128xf32, #tpu.memory_space<vmem>>, vector<128x128xf32>
    tpu.vector_store %arg4[%c0_5, %c0_6], %5 {strides = array<i32>} : memref<128x128xf32, #tpu.memory_space<vmem>>, vector<128x128xf32>,
    return
  }
  func.func @transform_0(%arg0: i32) -> (i32, i32) {
    %c0_i32 = arith.constant 0 : i32
    %c0_i32_0 = arith.constant 0 : i32
    return %arg0, %c0_i32 : i32, i32
  }
  func.func @transform_1(%arg0: i32) -> (i32, i32) {
    %c0_i32 = arith.constant 0 : i32
    %c0_i32_0 = arith.constant 0 : i32
    %c0_i32_1 = arith.constant 0 : i32
    return %c0_i32, %c0_i32_0 : i32, i32
  }
  func.func @transform_2(%arg0: i32) -> (i32, i32) {
    %c0_i32 = arith.constant 0 : i32
    %c0_i32_0 = arith.constant 0 : i32
    %c0_i32_1 = arith.constant 0 : i32
    return %c0_i32, %c0_i32_0 : i32, i32
  }
  func.func @transform_3(%arg0: i32) -> (i32, i32) {
    %c0_i32 = arith.constant 0 : i32
    %c0_i32_0 = arith.constant 0 : i32
    return %arg0, %c0_i32 : i32, i32
  }
}

</mosaic_0001>

<bundles_post_ra>
// kernel: contextual_attention_enhance.3
= control target key start
LH: loop header
LB: loop body
LE: loop exit
PB: predicated region body
PF: predicated region fallthrough
CT: control target
= control target key end

     0   :  { %vm104_vm0 = vcmask 1043456   ;;  %vm79_vm1 = vcmask 64512   ;;  %s506_s1 = inlined_call_operand.vmem [shape: bf16[8,128], index: 1, kind: input, shape index: {}]   ;;  %s507_s0 = inlined_call_operand.vmem [shape: bf16[128,8], index: 0, kind: input, shape index: {}]   ;;  %s508_s2 = inlined_call_operand.vmem [shape: f32[1,128], index: 2, kind: input, shape index: {}]   ;;  %s509_s3 = inlined_call_operand.vmem [shape: bf16[128,128], index: 3, kind: output, shape index: {}]  }
   0x1   :  { %v31_v0 = vld [vmem:[%s506_s1] sm:$0xf]  ;;  %v418_v4 = vld [vmem:[%s507_s0 + $0x8] sm:$0xff]   ;;  %v420_v6 = vld [vmem:[%s507_s0 + $0x10] sm:$0xff]  }
   0x2   :  { %414 = vmatprep.subr.msk.bf16.mxu0 %vm104_vm0, %v31_v0  ;;  %415 = vmatprep.subr.msk.bf16.mxu1 %vm104_vm0, %v31_v0  ;;  %v106_v1 = vsel %vm104_vm0, %v31_v0, 0  ;;  %v416_v2 = vld [vmem:[%s507_s0] sm:$0xff]   ;;  %v419_v5 = vld [vmem:[%s507_s0 + $0x28] sm:$0xff]   ;;  %v421_v7 = vld [vmem:[%s507_s0 + $0x30] sm:$0xff]  }
   0x3   :  { %395 = vmatpush3.bf16.msra.mxu0 %v106_v1  ;;  %413 = vmatpush3.bf16.msra.mxu1 %v106_v1  ;;  %v417_v3 = vld [vmem:[%s507_s0 + $0x20] sm:$0xff]   ;;  %v422_v8 = vld [vmem:[%s507_s0 + $0x18] sm:$0xff]  }
   0x4   :  { %396 = vmatprep.mubr.msk.bf16.mxu0 %vm79_vm1, %v416_v2  ;;  %404 = vmatprep.mubr.msk.bf16.mxu1 %vm79_vm1, %v417_v3  ;;  %v423_v9 = vld [vmem:[%s507_s0 + $0x38] sm:$0xff]   ;;  %v289_v11 = vld [vmem:[%s508_s2] ss:$0 sm:$0xff] }
   0x6   :  { %397 = vmatmul.mubr.msk.bf16.vlgmr.msra.gmra.mrb[0].mxu0 %vm79_vm1, %v418_v4  ;;  %405 = vmatmul.mubr.msk.bf16.vlgmr.msra.gmra.mrb[0].mxu1 %vm79_vm1, %v419_v5 }
   0x7   :  { %400 = vmatprep.mubr.msk.bf16.mxu0 %vm79_vm1, %v420_v6  ;;  %408 = vmatprep.mubr.msk.bf16.mxu1 %vm79_vm1, %v421_v7 }
   0xe   :  { %401 = vmatmul.mubr.msk.bf16.gmra.mrb[4].mxu0 %vm79_vm1, %v422_v8  ;;  %409 = vmatmul.mubr.msk.bf16.gmra.mrb[4].mxu1 %vm79_vm1, %v423_v9 }
  0xd9   :  { %v398_v10 = vpop.f32.mrb[0].mxu0  ;;  %v406_v12 = vpop.f32.mrb[0].mxu1 }
  0xda   :  { %v142_v13 = vpop.f32.mrb[1].mxu0  ;;  %v174_v14 = vpop.f32.mrb[1].mxu1  ;;  %v151_v16 = vadd.f32 %v398_v10, %v289_v11  ;;  %v183_v20 = vadd.f32 %v406_v12, %v289_v11 }
  0xdb   :  { %v399_v15 = vpop.f32.mrb[2].mxu0  ;;  %v407_v18 = vpop.f32.mrb[2].mxu1  ;;  %v143_v21 = vadd.f32 %v289_v11, %v142_v13  ;;  %v175_v25 = vadd.f32 %v289_v11, %v174_v14 }
  0xdc   :  { %v154_v17 = vadd.f32 %v399_v15, %v289_v11  ;;  %v145_v19 = vpop.f32.mrb[3].mxu0  ;;  %v186_v22 = vadd.f32 %v407_v18, %v289_v11  ;;  %v177_v24 = vpop.f32.mrb[3].mxu1 }
  0xdd   :  { %v146_v23 = vadd.f32 %v289_v11, %v145_v19  ;;  %v178_v27 = vadd.f32 %v289_v11, %v177_v24 }
  0xde   :  { %v346_v26 = vpack.c.bf16 %v154_v17, %v151_v16  ;;  %v366_v28 = vpack.c.bf16 %v186_v22, %v183_v20 }
  0xdf   :  { %v341_v29 = vpack.c.bf16 %v146_v23, %v143_v21  ;;  %v361_v30 = vpack.c.bf16 %v178_v27, %v175_v25 }
  0xe0   :  { %378 = vst [vmem:[%s509_s3 + $0x8] sm:$0xff] %v346_v26   ;;  %382 = vst [vmem:[%s509_s3 + $0x28] sm:$0xff] %v366_v28  }
  0xe1   :  { %342 = vst [vmem:[%s509_s3] sm:$0xff] %v341_v29   ;;  %v402_v31 = vpop.f32.mrb[4].mxu0  ;;  %381 = vst [vmem:[%s509_s3 + $0x20] sm:$0xff] %v361_v30   ;;  %v410_v32 = vpop.f32.mrb[4].mxu1 }
  0xe2   :  { %v158_v33 = vpop.f32.mrb[5].mxu0  ;;  %v190_v34 = vpop.f32.mrb[5].mxu1  ;;  %v167_v36 = vadd.f32 %v402_v31, %v289_v11  ;;  %v199_v40 = vadd.f32 %v410_v32, %v289_v11 }
  0xe3   :  { %v403_v35 = vpop.f32.mrb[6].mxu0  ;;  %v411_v38 = vpop.f32.mrb[6].mxu1  ;;  %v159_v41 = vadd.f32 %v289_v11, %v158_v33  ;;  %v191_v45 = vadd.f32 %v289_v11, %v190_v34 }
  0xe4   :  { %v170_v37 = vadd.f32 %v403_v35, %v289_v11  ;;  %v161_v39 = vpop.f32.mrb[7].mxu0  ;;  %v202_v42 = vadd.f32 %v411_v38, %v289_v11  ;;  %v193_v44 = vpop.f32.mrb[7].mxu1 }
  0xe5   :  { %v162_v43 = vadd.f32 %v289_v11, %v161_v39  ;;  %v194_v47 = vadd.f32 %v289_v11, %v193_v44 }
  0xe6   :  { %v356_v46 = vpack.c.bf16 %v170_v37, %v167_v36  ;;  %v376_v48 = vpack.c.bf16 %v202_v42, %v199_v40 }
  0xe7   :  { %v351_v49 = vpack.c.bf16 %v162_v43, %v159_v41  ;;  %v371_v50 = vpack.c.bf16 %v194_v47, %v191_v45 }
  0xe8   :  { %380 = vst [vmem:[%s509_s3 + $0x18] sm:$0xff] %v356_v46   ;;  %384 = vst [vmem:[%s509_s3 + $0x38] sm:$0xff] %v376_v48  }
  0xe9   :  { %379 = vst [vmem:[%s509_s3 + $0x10] sm:$0xff] %v351_v49   ;;  %383 = vst [vmem:[%s509_s3 + $0x30] sm:$0xff] %v371_v50  }

// kernel: contextual_attention_enhance.4
= control target key start
LH: loop header
LB: loop body
LE: loop exit
PB: predicated region body
PF: predicated region fallthrough
CT: control target
= control target key end

     0   :  { %s1108_s12 = smov 0   ;;  %s1110_s13 = smov 0   ;;  %s1194_s0 = inlined_call_operand.vmem [shape: bf16[2,16,128], index: 0, kind: input, shape index: {}]   ;;  %s1195_s1 = inlined_call_operand.vmem [shape: bf16[2,128,128], index: 1, kind: input, shape index: {}]   ;;  %s1196_s2 = inlined_call_operand.vmem [shape: bf16[2,128,128], index: 2, kind: input, shape index: {}]   ;;  %s1197_s3 = inlined_call_operand.vmem [shape: f32[2,16,128], index: 3, kind: output, shape index: {}]  }
   0x1   :  { %s1112_s14 = smov 0  }
   0x2 LB: > { %s32_s15 = sadd.s32 1, %s1078_s13  ;;  %p903_p0 = scmp.ge.s32.totalorder %s1082_s14, 1  ;;  %s1082_s14 = sphi %s1112_s14, %s13_s14   ;;  %s1078_s13 = sphi %s1110_s13, %s1199_s13   ;;  %s1074_s12 = sphi %s1108_s12, %s1198_s12  }
   0x3   : > { %p34_p1 = scmp.ge.s32.totalorder %s32_s15, 2  ;;  %p199_p2 = scmp.lt.s32.totalorder %s1082_s14, 3 }
   0x5   : > { %s1201_s15 = smov (%p34_p1, %s32_s15), 0  ;;  %p200_p3 = pnand %p903_p0, %p199_p2 }
   0x6   : > { %p250_p4 = scmp.lt.s32.totalorder (!%p200_p3), %s1074_s12, 1  ;;  %v1084_v0 = vmov (!%p200_p3), 0.0   ;;  %vm1085_vm0 = vmmov (!%p200_p3), 0   ;;  %vm294_vm1 = vcmask (!%p200_p3), 7168   ;;  %v1086_v10 = vmov (!%p200_p3), -1e+30  }
   0x7   : > { %203 = sbr.rel (%p200_p3) target bundleno = 881 (0x371), region = 32  ;;  %961 = vmatprep.subr.bf16.mxu0 (!%p200_p3), %v1084_v0  ;;  %977 = vmatprep.mubr.msk.bf16.mxu0 (!%p200_p3), %vm1085_vm0, %v1084_v0  ;;  %295 = vst.msk [vmem:[#allocation2] sm:$0xff] (!%p200_p3), %vm294_vm1, %v1086_v10  ;;  %296 = vst.msk [vmem:[#allocation2 + $0x8] sm:$0xff] (!%p200_p3), %vm294_vm1, %v1086_v10  ;;  %v593_v11 = vlaneseq (!%p200_p3)  ;;  %v1087_v21 = vmov (!%p200_p3), 0  }
   0x8   : > { %981 = vmatprep.subr.bf16.mxu1 (!%p200_p3), %v1084_v0  ;;  %997 = vmatprep.mubr.msk.bf16.mxu1 (!%p200_p3), %vm1085_vm0, %v1084_v0  ;;  %297 = vst.msk [vmem:[#allocation3] sm:$0xff] (!%p200_p3), %vm294_vm1, %v1084_v0  ;;  %298 = vst.msk [vmem:[#allocation3 + $0x8] sm:$0xff] (!%p200_p3), %vm294_vm1, %v1084_v0 }
   0x9   : > { %v594_v12 = vand.u32 (!%p200_p3), 127, %v593_v11  ;;  %1029 = vset.pattern.permute.xlu1 (!%p200_p3), %v1087_v21  ;;  %1030 = vset.pattern.permute.xlu0 (!%p200_p3), %v1087_v21 }
   0xb   : > { %vm597_vm2 = vcmp.lt.s32.totalorder (!%p200_p3), %v594_v12, 64 }
   0xe   : > { %s1203_s12 = smov (!%p250_p4, %s1074_s12), 1  ;;  %v600_v25 = vld [vmem:[#allocation2] sm:$0xff]  ;;  %v601_v28 = vld [vmem:[#allocation2 + $0x8] sm:$0xff] }
   0xf   : > { %s940_s16 = sshll.u32 %s1203_s12, 6  ;;  %s939_s20 = sshll.u32 %s1203_s12, 3  ;;  %v630_v51 = vld [vmem:[#allocation3] sm:$0xff]  ;;  %v631_v54 = vld [vmem:[#allocation3 + $0x8] sm:$0xff] }
  0x10   : > { %s267_s19 = scalar_lea.vmem %s1195_s1, %s940_s16  ;;  %s257_s23 = scalar_lea.vmem %s1194_s0, %s939_s20 }
  0x11   : > { %v1031_v1 = vld [vmem:[%s267_s19] sm:$0xff]   ;;  %v1032_v2 = vld [vmem:[%s267_s19 + $0x8] sm:$0xff]   ;;  %v1033_v3 = vld [vmem:[%s267_s19 + $0x10] sm:$0xff]   ;;  %s1160_s26 = scalar_lea.vmem %s1196_s2, %s940_s16  ;;  %s942_s27 = sshll.u32 %s1203_s12, 4 }
  0x12   : > { %962 = vmatpush3.bf16.xpose.msra.mxu0 %v1031_v1  ;;  %v1034_v4 = vld [vmem:[%s267_s19 + $0x18] sm:$0xff]   ;;  %v1035_v5 = vld [vmem:[%s267_s19 + $0x20] sm:$0xff]   ;;  %v1036_v6 = vld [vmem:[%s267_s19 + $0x28] sm:$0xff]   ;;  %s287_s30 = scalar_lea.vmem %s1197_s3, %s942_s27 }
  0x13   : > { %963 = vmatprep.subr.bf16.mxu0 %v1084_v0  ;;  %v1037_v7 = vld [vmem:[%s267_s19 + $0x30] sm:$0xff]   ;;  %v1038_v8 = vld [vmem:[%s267_s19 + $0x38] sm:$0xff]   ;;  %v1039_v9 = vld [vmem:[%s257_s23] sm:$0xff]  }
  0x14   : > { %v1040_v22 = vld [vmem:[%s1160_s26] sm:$0xff]   ;;  %v1041_v23 = vld [vmem:[%s1160_s26 + $0x8] sm:$0xff]   ;;  %v1042_v24 = vld [vmem:[%s1160_s26 + $0x10] sm:$0xff]  }
  0x15   : > { %982 = vmatpush3.bf16.msra.mxu1 %v1040_v22  ;;  %v1043_v30 = vld [vmem:[%s1160_s26 + $0x18] sm:$0xff]   ;;  %v1044_v34 = vld [vmem:[%s1160_s26 + $0x20] sm:$0xff]   ;;  %v1045_v35 = vld [vmem:[%s1160_s26 + $0x28] sm:$0xff]  }
  0x16   : > { %983 = vmatprep.subr.bf16.mxu1 %v1084_v0  ;;  %v1046_v36 = vld [vmem:[%s1160_s26 + $0x30] sm:$0xff]   ;;  %v1047_v37 = vld [vmem:[%s1160_s26 + $0x38] sm:$0xff]  }
  0x19   : > { %984 = vmatpush3.bf16.msra.mxu1 %v1041_v23 }
  0x1a   : > { %964 = vmatpush3.bf16.xpose.msra.mxu0 %v1032_v2  ;;  %985 = vmatprep.subr.bf16.mxu1 %v1084_v0 }
  0x1b   : > { %965 = vmatprep.subr.bf16.mxu0 %v1084_v0 }
  0x1d   : > { %986 = vmatpush3.bf16.msra.mxu1 %v1042_v24 }
  0x1e   : > { %987 = vmatprep.subr.bf16.mxu1 %v1084_v0 }
  0x21   : > { %988 = vmatpush3.bf16.msra.mxu1 %v1043_v30 }
  0x22   : > { %966 = vmatpush3.bf16.xpose.msra.mxu0 %v1033_v3  ;;  %989 = vmatprep.subr.bf16.mxu1 %v1084_v0 }
  0x23   : > { %967 = vmatprep.subr.bf16.mxu0 %v1084_v0 }
  0x25   : > { %990 = vmatpush3.bf16.msra.mxu1 %v1044_v34 }
  0x26   : > { %991 = vmatprep.subr.bf16.mxu1 %v1084_v0 }
  0x29   : > { %992 = vmatpush3.bf16.msra.mxu1 %v1045_v35 }
  0x2a   : > { %968 = vmatpush3.bf16.xpose.msra.mxu0 %v1034_v4  ;;  %993 = vmatprep.subr.bf16.mxu1 %v1084_v0 }
  0x2b   : > { %969 = vmatprep.subr.bf16.mxu0 %v1084_v0 }
  0x2d   : > { %994 = vmatpush3.bf16.msra.mxu1 %v1046_v36 }
  0x2e   : > { %995 = vmatprep.subr.bf16.mxu1 %v1084_v0 }
  0x31   : > { %996 = vmatpush3.bf16.msra.mxu1 %v1047_v37 }
  0x32   : > { %970 = vmatpush3.bf16.xpose.msra.mxu0 %v1035_v5 }
  0x33   : > { %971 = vmatprep.subr.bf16.mxu0 %v1084_v0 }
  0x3a   : > { %972 = vmatpush3.bf16.xpose.msra.mxu0 %v1036_v6 }
  0x3b   : > { %973 = vmatprep.subr.bf16.mxu0 %v1084_v0 }
  0x42   : > { %974 = vmatpush3.bf16.xpose.msra.mxu0 %v1037_v7 }
  0x43   : > { %975 = vmatprep.subr.bf16.mxu0 %v1084_v0 }
  0x4a   : > { %976 = vmatpush3.bf16.xpose.msra.mxu0 %v1038_v8 }
  0x51   : > { %978 = vmatmul.mubr.bf16.vlgmr.msra.gmra.mrb[0].mxu0 %v1039_v9 }
 0x124   : > { %v423_v13 = vpop.f32.mrb[0].mxu0 }
 0x125   : > { %v430_v14 = vmul.f32 10.0, %v423_v13  ;;  %v979_v15 = vpop.f32.mrb[1].mxu0 }
 0x126   : > { %v426_v16 = vpop.f32.mrb[2].mxu0 }
 0x127   : > { %v431_v17 = vmul.f32 10.0, %v426_v16  ;;  %v980_v18 = vpop.f32.mrb[3].mxu0  ;;  %v598_v19 = vsel %vm597_vm2, %v430_v14, -1e+30 }
 0x128   : > { %602 = vmax.xlane.f32.xlu0 %v598_v19 }
 0x129   : > { %v599_v20 = vsel %vm597_vm2, %v431_v17, -1e+30 }
 0x12c   : > { %604 = vmax.xlane.f32.xlu0 %v599_v20 }
 0x1b5   : > { %v603_v26 = vpop.xlane.xlu0 %602 }
 0x1b6   : > { %v606_v27 = vmax.f32 %v600_v25, %v603_v26 }
 0x1b8   : > { %v608_v29 = vsub.f32 %v600_v25, %v606_v27  ;;  %751 = vst.msk [vmem:[#allocation2] sm:$0xff] %vm294_vm1, %v606_v27  ;;  %616 = vperm.xlu1 %1029, %v606_v27  }
 0x1b9   : > { %v605_v31 = vpop.xlane.xlu0 %604 }
 0x1ba   : > { %v607_v32 = vmax.f32 %v601_v28, %v605_v31  ;;  %v610_v48 = vmul.f32 1.442695, %v608_v29 }
 0x1bc   : > { %v609_v33 = vsub.f32 %v601_v28, %v607_v32  ;;  %752 = vst.msk [vmem:[#allocation2 + $0x8] sm:$0xff] %vm294_vm1, %v607_v32  ;;  %621 = vperm.xlu1 %1029, %v607_v32  }
 0x1be   : > { %v612_v47 = vmul.f32 1.442695, %v609_v33 }
 0x237   : > { %v617_v38 = vpop.permute.xlu1 %616 }
 0x238   : > { %v624_v39 = vsub.f32 %v598_v19, %v617_v38 }
 0x23a   : > { %v626_v40 = vmul.f32 1.442695, %v624_v39 }
 0x23b   : > { %v622_v41 = vpop.permute.xlu1 %621 }
 0x23c   : > { %1048 = vpow2.f32 %v626_v40  ;;  %v625_v42 = vsub.f32 %v599_v20, %v622_v41 }
 0x23e   : > { %v628_v43 = vmul.f32 1.442695, %v625_v42 }
 0x240   : > { %1050 = vpow2.f32 %v628_v43 }
 0x241   : > { %1052 = vpow2.f32 %v612_v47 }
 0x242   : > { %1054 = vpow2.f32 %v610_v48 }
 0x246   : > { %v1049_v44 = vpop.eup %1048 }
 0x247   : > { %634 = vadd.xlane.f32.xlu0 %v1049_v44 }
 0x24a   : > { %v1051_v45 = vpop.eup %1050 }
 0x24b   : > { %636 = vadd.xlane.f32.xlu1 %v1051_v45  ;;  %v657_v46 = vpack.c.bf16 %v1051_v45, %v1049_v44  ;;  %v1053_v49 = vpop.eup %1052 }
 0x24c   : > { %v1055_v50 = vpop.eup %1054  ;;  %v633_v56 = vmul.f32 %v1053_v49, %v631_v54 }
 0x24d   : > { %998 = vmatmul.mubr.bf16.vlgmr.msra.gmra.mrb[0].mxu1 %v657_v46  ;;  %v632_v52 = vmul.f32 %v1055_v50, %v630_v51 }
 0x25c   : > { %652 = vperm.xlu1 %1029, %v1053_v49  }
 0x25d   : > { %647 = vperm.xlu0 %1030, %v1055_v50  }
 0x2d4   : > { %v635_v53 = vpop.xlane.xlu0 %634 }
 0x2d5   : > { %v638_v55 = vadd.f32 %v635_v53, %v632_v52 }
 0x2d7   : > { %641 = vst.msk [vmem:[#allocation3] sm:$0xff] %vm294_vm1, %v638_v55 }
 0x2d8   : > { %v637_v57 = vpop.xlane.xlu1 %636 }
 0x2d9   : > { %v639_v58 = vadd.f32 %v637_v57, %v633_v56 }
 0x2db   : > { %642 = vst.msk [vmem:[#allocation3 + $0x8] sm:$0xff] %vm294_vm1, %v639_v58 }
 0x2dc   : > { %v648_v3 = vpop.permute.xlu0 %647  ;;  %v653_v5 = vpop.permute.xlu1 %652 }
 0x2dd   : > { %v655_v4 = vmul.f32 0.0, %v648_v3  ;;  %v656_v8 = vmul.f32 0.0, %v653_v5 }
 0x2de   : > { %v755_v59 = vld [vmem:[#allocation3] sm:$0xff] }
 0x2df   : > { %1056 = vrcp.f32 %v755_v59 }
 0x2e2   : > { %v756_v60 = vld [vmem:[#allocation3 + $0x8] sm:$0xff] }
 0x2e3   : > { %1058 = vrcp.f32 %v756_v60 }
 0x2e9   : > { %v1057_v61 = vpop.eup %1056 }
 0x2ea   : > { %761 = vperm.xlu0 %1030, %v1057_v61  }
 0x2ed   : > { %v1059_v62 = vpop.eup %1058 }
 0x2ee   : > { %766 = vperm.xlu0 %1030, %v1059_v62  }
 0x320   : > { %v740_v63 = vpop.f32.mrb[0].mxu1 }
 0x321   : > { %v999_v0 = vpop.f32.mrb[1].mxu1  ;;  %v747_v6 = vadd.f32 %v740_v63, %v655_v4 }
 0x322   : > { %v743_v1 = vpop.f32.mrb[2].mxu1 }
 0x323   : > { %v1000_v2 = vpop.f32.mrb[3].mxu1  ;;  %v748_v10 = vadd.f32 %v743_v1, %v656_v8 }
 0x369   : > { %v762_v7 = vpop.permute.xlu0 %761 }
 0x36a   : > { %v769_v9 = vmul.f32 %v762_v7, %v747_v6 }
 0x36c   : > { %771 = vst [vmem:[%s287_s30] sm:$0xff] %v769_v9 }
 0x36d   : > { %v767_v11 = vpop.permute.xlu0 %766 }
 0x36e   : > { %v770_v12 = vmul.f32 %v767_v11, %v748_v10 }
 0x370   : > { %772 = vst [vmem:[%s287_s30 + $0x8] sm:$0xff] %v770_v12 }
 0x371 PF: > { %s13_s14 = sadd.s32 1, %s1082_s14   ;;  %s1198_s12 = smov %s1078_s13 }
 0x372   : > { %p10_p5 = scmp.ge.s32.totalorder %s13_s14, 4   ;;  %s1199_s13 = smov %s1201_s15 }
 0x374   :  { %12 = sbr.rel (!%p10_p5) target bundleno = 2 (0x2), region = 80 }

// kernel: contextual_attention_enhance.5
= control target key start
LH: loop header
LB: loop body
LE: loop exit
PB: predicated region body
PF: predicated region fallthrough
CT: control target
= control target key end

     0   :  { %vm104_vm0 = vcmask 1041408   ;;  %vm79_vm1 = vcmask 31744   ;;  %s387_s1 = inlined_call_operand.vmem [shape: bf16[4,128], index: 1, kind: input, shape index: {}]   ;;  %s388_s0 = inlined_call_operand.vmem [shape: bf16[128,4], index: 0, kind: input, shape index: {}]   ;;  %s389_s2 = inlined_call_operand.vmem [shape: f32[1,128], index: 2, kind: input, shape index: {}]   ;;  %s390_s3 = inlined_call_operand.vmem [shape: f32[128,128], index: 3, kind: output, shape index: {}]  }
   0x1   :  { %v31_v0 = vld [vmem:[%s387_s1] sm:$0x3]  ;;  %v275_v4 = vld [vmem:[%s388_s0 + $0x8] sm:$0xff]   ;;  %v277_v6 = vld [vmem:[%s388_s0 + $0x10] sm:$0xff]  }
   0x2   :  { %271 = vmatprep.subr.msk.bf16.mxu0 %vm104_vm0, %v31_v0  ;;  %272 = vmatprep.subr.msk.bf16.mxu1 %vm104_vm0, %v31_v0  ;;  %v106_v1 = vsel %vm104_vm0, %v31_v0, 0  ;;  %v273_v2 = vld [vmem:[%s388_s0] sm:$0xff]   ;;  %v276_v5 = vld [vmem:[%s388_s0 + $0x28] sm:$0xff]   ;;  %v278_v7 = vld [vmem:[%s388_s0 + $0x30] sm:$0xff]  }
   0x3   :  { %252 = vmatpush3.bf16.msra.mxu0 %v106_v1  ;;  %270 = vmatpush3.bf16.msra.mxu1 %v106_v1  ;;  %v274_v3 = vld [vmem:[%s388_s0 + $0x20] sm:$0xff]   ;;  %v279_v8 = vld [vmem:[%s388_s0 + $0x18] sm:$0xff]  }
   0x4   :  { %253 = vmatprep.mubr.msk.bf16.mxu0 %vm79_vm1, %v273_v2  ;;  %261 = vmatprep.mubr.msk.bf16.mxu1 %vm79_vm1, %v274_v3  ;;  %v280_v9 = vld [vmem:[%s388_s0 + $0x38] sm:$0xff]   ;;  %v225_v10 = vld [vmem:[%s389_s2] ss:$0 sm:$0xff] }
   0x6   :  { %254 = vmatmul.mubr.msk.bf16.vlgmr.msra.gmra.mrb[0].mxu0 %vm79_vm1, %v275_v4  ;;  %262 = vmatmul.mubr.msk.bf16.vlgmr.msra.gmra.mrb[0].mxu1 %vm79_vm1, %v276_v5 }
   0x7   :  { %257 = vmatprep.mubr.msk.bf16.mxu0 %vm79_vm1, %v277_v6  ;;  %265 = vmatprep.mubr.msk.bf16.mxu1 %vm79_vm1, %v278_v7 }
   0xe   :  { %258 = vmatmul.mubr.msk.bf16.gmra.mrb[4].mxu0 %vm79_vm1, %v279_v8  ;;  %266 = vmatmul.mubr.msk.bf16.gmra.mrb[4].mxu1 %vm79_vm1, %v280_v9 }
  0xd9   :  { %v255_v11 = vpop.f32.mrb[0].mxu0  ;;  %v263_v13 = vpop.f32.mrb[0].mxu1 }
  0xda   :  { %v151_v12 = vadd.f32 %v255_v11, %v225_v10  ;;  %v142_v14 = vpop.f32.mrb[1].mxu0  ;;  %v183_v15 = vadd.f32 %v263_v13, %v225_v10  ;;  %v174_v17 = vpop.f32.mrb[1].mxu1 }
  0xdb   :  { %v143_v16 = vadd.f32 %v225_v10, %v142_v14  ;;  %v256_v18 = vpop.f32.mrb[2].mxu0  ;;  %v175_v19 = vadd.f32 %v225_v10, %v174_v17  ;;  %v264_v21 = vpop.f32.mrb[2].mxu1 }
  0xdc   :  { %207 = vst [vmem:[%s390_s3 + $0x10] sm:$0xff] %v151_v12  ;;  %v154_v20 = vadd.f32 %v256_v18, %v225_v10  ;;  %v145_v22 = vpop.f32.mrb[3].mxu0  ;;  %215 = vst [vmem:[%s390_s3 + $0x50] sm:$0xff] %v183_v15  ;;  %v186_v23 = vadd.f32 %v264_v21, %v225_v10  ;;  %v177_v25 = vpop.f32.mrb[3].mxu1 }
  0xdd   :  { %205 = vst [vmem:[%s390_s3] sm:$0xff] %v143_v16  ;;  %v146_v24 = vadd.f32 %v225_v10, %v145_v22  ;;  %213 = vst [vmem:[%s390_s3 + $0x40] sm:$0xff] %v175_v19  ;;  %v178_v26 = vadd.f32 %v225_v10, %v177_v25 }
  0xde   :  { %208 = vst [vmem:[%s390_s3 + $0x18] sm:$0xff] %v154_v20  ;;  %216 = vst [vmem:[%s390_s3 + $0x58] sm:$0xff] %v186_v23 }
  0xdf   :  { %206 = vst [vmem:[%s390_s3 + $0x8] sm:$0xff] %v146_v24  ;;  %214 = vst [vmem:[%s390_s3 + $0x48] sm:$0xff] %v178_v26 }
  0xe1   :  { %v259_v27 = vpop.f32.mrb[4].mxu0  ;;  %v267_v29 = vpop.f32.mrb[4].mxu1 }
  0xe2   :  { %v167_v28 = vadd.f32 %v259_v27, %v225_v10  ;;  %v158_v30 = vpop.f32.mrb[5].mxu0  ;;  %v199_v31 = vadd.f32 %v267_v29, %v225_v10  ;;  %v190_v33 = vpop.f32.mrb[5].mxu1 }
  0xe3   :  { %v159_v32 = vadd.f32 %v225_v10, %v158_v30  ;;  %v260_v34 = vpop.f32.mrb[6].mxu0  ;;  %v191_v35 = vadd.f32 %v225_v10, %v190_v33  ;;  %v268_v37 = vpop.f32.mrb[6].mxu1 }
  0xe4   :  { %211 = vst [vmem:[%s390_s3 + $0x30] sm:$0xff] %v167_v28  ;;  %v170_v36 = vadd.f32 %v260_v34, %v225_v10  ;;  %v161_v38 = vpop.f32.mrb[7].mxu0  ;;  %219 = vst [vmem:[%s390_s3 + $0x70] sm:$0xff] %v199_v31  ;;  %v202_v39 = vadd.f32 %v268_v37, %v225_v10  ;;  %v193_v41 = vpop.f32.mrb[7].mxu1 }
  0xe5   :  { %209 = vst [vmem:[%s390_s3 + $0x20] sm:$0xff] %v159_v32  ;;  %v162_v40 = vadd.f32 %v225_v10, %v161_v38  ;;  %217 = vst [vmem:[%s390_s3 + $0x60] sm:$0xff] %v191_v35  ;;  %v194_v42 = vadd.f32 %v225_v10, %v193_v41 }
  0xe6   :  { %212 = vst [vmem:[%s390_s3 + $0x38] sm:$0xff] %v170_v36  ;;  %220 = vst [vmem:[%s390_s3 + $0x78] sm:$0xff] %v202_v39 }
  0xe7   :  { %210 = vst [vmem:[%s390_s3 + $0x28] sm:$0xff] %v162_v40  ;;  %218 = vst [vmem:[%s390_s3 + $0x68] sm:$0xff] %v194_v42 }

</bundles_post_ra>
